<compile_context>
chip_gen: v7x
topology: tpu7x:2x2x1
jax: 0.10.0
libtpu: 0.0.40
codegen_flags: <defaults>
</compile_context>

<pallas_src>
import functools

import jax
import jax.numpy as jnp
from jax import lax
from jax.experimental import pallas as pl
from jax.experimental.pallas import tpu as pltpu


def _energy_attn_kernel(x_ref, attn_ref, energy_acc, *, gram_dtype):
    """Pass 1: accumulate the CxC Gram over spatial tiles, then softmax."""
    k = pl.program_id(1)

    @pl.when(k == 0)
    def _():
        energy_acc[...] = jnp.zeros_like(energy_acc)

    x = x_ref[0].astype(gram_dtype)                       # (C, TN)
    # Gram over spatial positions: contract the lane (N) dim of both operands
    # directly instead of materializing x.T (avoids an XLU transpose + copy).
    energy_acc[...] += lax.dot_general(
        x, x,
        dimension_numbers=(((1,), (1,)), ((), ())),
        preferred_element_type=jnp.float32,
    )

    @pl.when(k == pl.num_programs(1) - 1)
    def _():
        energy = energy_acc[...]                          # (C, C) f32
        # PyTorch: softmax(rowmax(E) - E).  Softmax is shift-invariant, so
        # this equals softmax(-E); the numerically-stable argument is
        # rowmin(E) - E (<= 0 everywhere).  One reduction + one subtract,
        # instead of two reductions + two subtracts.
        shifted = jnp.min(energy, axis=-1, keepdims=True) - energy
        expd = jnp.exp(shifted)
        inv = pl.reciprocal(jnp.sum(expd, axis=-1, keepdims=True), approx=False)
        attn_ref[0] = (expd * inv).astype(attn_ref.dtype)


def _apply_attn_kernel(gamma_ref, attn_ref, x_ref, o_ref, *, pv_dtype):
    """Pass 2: per spatial tile, out = gamma * (attn @ x_tile) + x_tile."""
    x = x_ref[0]                                          # (C, TN) f32
    attn = attn_ref[0]                                    # (C, C)  f32
    out = jnp.dot(attn.astype(pv_dtype), x.astype(pv_dtype),
                  preferred_element_type=jnp.float32)     # (C, TN) f32
    gamma = gamma_ref[0]                                  # scalar from SMEM
    o_ref[0] = (gamma * out + x.astype(jnp.float32)).astype(o_ref.dtype)


def cam_module(x, gamma, *, tile_n=1024,
               gram_dtype=jnp.float32, pv_dtype=jnp.bfloat16):
    """Channel attention: x (B, C, H, W) f32, gamma (1,) f32 -> (B, C, H, W)."""
    B, C, H, W = x.shape
    N = H * W
    x_flat = x.reshape(B, C, N)

    # Lane-align the spatial dim: pad N up to a multiple of 128 and of the
    # tile size so every tile store is unmasked (lane-dense) and the (8,128)
    # block rule is satisfied.  Zero padding is exact for this op.
    tile_n = -(-tile_n // 128) * 128
    n_pad128 = -(-N // 128) * 128
    if n_pad128 <= tile_n:
        tn = n_pad128
        n_padded = n_pad128
    else:
        tn = tile_n
        n_padded = -(-N // tn) * tn
    if n_padded != N:
        x_flat = jnp.pad(x_flat, ((0, 0), (0, 0), (0, n_padded - N)))
    k_steps = n_padded // tn

    # Pass 1: per-batch channel attention matrix (B, C, C).
    attn = pl.pallas_call(
        functools.partial(_energy_attn_kernel, gram_dtype=gram_dtype),
        out_shape=jax.ShapeDtypeStruct((B, C, C), jnp.float32),
        grid=(B, k_steps),
        in_specs=[pl.BlockSpec((1, C, tn), lambda b, k: (b, 0, k))],
        out_specs=pl.BlockSpec((1, C, C), lambda b, k: (b, 0, 0)),
        scratch_shapes=[pltpu.VMEM((C, C), jnp.float32)],
        compiler_params=pltpu.CompilerParams(
            dimension_semantics=("parallel", "arbitrary")),
    )(x_flat)

    # Pass 2: attention-weighted values + residual, streamed tile by tile.
    out_flat = pl.pallas_call(
        functools.partial(_apply_attn_kernel, pv_dtype=pv_dtype),
        out_shape=jax.ShapeDtypeStruct((B, C, n_padded), x.dtype),
        grid=(B, k_steps),
        in_specs=[
            pl.BlockSpec(memory_space=pltpu.MemorySpace.SMEM),      # gamma
            pl.BlockSpec((1, C, C), lambda b, k: (b, 0, 0)),        # attention
            pl.BlockSpec((1, C, tn), lambda b, k: (b, 0, k)),       # x tile
        ],
        out_specs=pl.BlockSpec((1, C, tn), lambda b, k: (b, 0, k)),
        compiler_params=pltpu.CompilerParams(
            dimension_semantics=("parallel", "parallel")),
    )(gamma, attn, x_flat)

    if n_padded != N:
        out_flat = out_flat[:, :, :N]
    return out_flat.reshape(B, C, H, W)


def cam_reference(x, gamma):
    """Pure-JAX reference mirroring the PyTorch forward (full f32 precision)."""
    B, C, H, W = x.shape
    q = x.reshape(B, C, -1)                               # (B, C, N)
    energy = jnp.einsum("bcn,bdn->bcd", q, q, precision="highest")
    energy_new = jnp.max(energy, axis=-1, keepdims=True) - energy
    attn = jax.nn.softmax(energy_new, axis=-1)
    out = jnp.einsum("bcd,bdn->bcn", attn, q,
                     precision="highest").reshape(B, C, H, W)
    return gamma[0] * out + x


if __name__ == "__main__":
    key = jax.random.PRNGKey(0)
    B, C, H, W = 2, 4, 16, 16
    x = jax.random.normal(key, (B, C, H, W), dtype=jnp.float32)

    # Parameter init matches nn.Parameter(torch.zeros(1)); also use a nonzero
    # gamma so the attention path is actually exercised.
    gamma_zero = jnp.zeros((1,), dtype=jnp.float32)
    gamma_test = jnp.array([0.5], dtype=jnp.float32)

    ref = cam_reference(x, gamma_test)

    # 1) gamma = 0: output must equal the input exactly, any precision mode.
    out0 = jax.block_until_ready(cam_module(x, gamma_zero))
    assert jnp.allclose(out0, x, atol=1e-6)

    # 2) Full-precision MXU path: tight check against the f32 reference.
    out_f32 = jax.block_until_ready(
        cam_module(x, gamma_test, pv_dtype=jnp.float32))
    assert jnp.allclose(out_f32, ref, atol=1e-4, rtol=1e-4)

    # 3) Default fast path (bf16 attn@V operands, f32 accumulation).
    out_fast = jax.block_until_ready(cam_module(x, gamma_test))
    assert jnp.allclose(out_fast, ref, atol=3e-2, rtol=3e-2)

    # 4) Exercise the N-tiling / accumulator path (two spatial tiles).
    out_tiled = jax.block_until_ready(
        cam_module(x, gamma_test, tile_n=128, pv_dtype=jnp.float32))
    assert jnp.allclose(out_tiled, ref, atol=1e-4, rtol=1e-4)

    print("KERNEL_OK")
</pallas_src>

<mosaic_0001>
module attributes {stable_mosaic.version = 11 : i64} {
  func.func @_energy_attn_kernel(%arg0: i32, %arg1: i32, %arg2: memref<1x4x256xf32, #tpu.memory_space<vmem>>, %arg3: memref<1x4x4xf32, #tpu.memory_space<vmem>>, %arg4: memref<4x4xf32, #tpu.memory_space<vmem>>) attributes {dimension_semantics = [#tpu.dimension_semantics<parallel>, #tpu.dimension_semantics<arbitrary>], iteration_bounds = array<i64: 2, 1>, scalar_prefetch = 0 : i64, scratch_operands = 1 : i64, tpu.core_type = #tpu.core_type<tc>, window_params = [{transform_indices = @transform_0, window_bounds = array<i64: 1, 4, 256>}, {transform_indices = @transform_1, window_bounds = array<i64: 1, 4, 4>}]} {
    %c0_i32 = arith.constant 0 : i32
    %0 = arith.cmpi eq, %arg1, %c0_i32 : i32
    %1 = arith.extui %0 : i1 to i32
    %c0_i32_0 = arith.constant 0 : i32
    %2 = arith.cmpi ne, %1, %c0_i32_0 : i32
    scf.if %2 {
      %cst_9 = arith.constant 0.000000e+00 : f32
      %12 = vector.broadcast %cst_9 : f32 to vector<4x4xf32>
      %c0_10 = arith.constant 0 : index
      %c0_11 = arith.constant 0 : index
      %13 = vector.load %arg4[%c0_10, %c0_11] : memref<4x4xf32, #tpu.memory_space<vmem>>, vector<4x4xf32>
      tpu.vector_store %arg4[%c0_10, %c0_11], %12 {strides = array<i32>} : memref<4x4xf32, #tpu.memory_space<vmem>>, vector<4x4xf32>,
    } else {
    }
    %c0 = arith.constant 0 : index
    %c0_1 = arith.constant 0 : index
    %c0_2 = arith.constant 0 : index
    %3 = vector.load %arg2[%c0, %c0_1, %c0_2] : memref<1x4x256xf32, #tpu.memory_space<vmem>>, vector<1x4x256xf32>
    %4 = vector.shape_cast %3 : vector<1x4x256xf32> to vector<4x256xf32>
    %c0_3 = arith.constant 0 : index
    %c0_4 = arith.constant 0 : index
    %5 = vector.load %arg4[%c0_3, %c0_4] : memref<4x4xf32, #tpu.memory_space<vmem>>, vector<4x4xf32>
    %cst = arith.constant dense<0.000000e+00> : vector<4x4xf32>
    %6 = tpu.matmul %4, %4, %cst {dimension_numbers = #tpu.dot_dimension_numbers<[1], [1], [0], [0], [0, 0, 1, 0], [], []>} : vector<4x256xf32>, vector<4x256xf32>, vector<4x4xf32> -> vector<4x4xf32>
    %7 = arith.addf %5, %6 : vector<4x4xf32>
    %c0_5 = arith.constant 0 : index
    %c0_6 = arith.constant 0 : index
    %8 = vector.load %arg4[%c0_5, %c0_6] : memref<4x4xf32, #tpu.memory_space<vmem>>, vector<4x4xf32>
    tpu.vector_store %arg4[%c0_5, %c0_6], %7 {strides = array<i32>} : memref<4x4xf32, #tpu.memory_space<vmem>>, vector<4x4xf32>,
    %c0_i32_7 = arith.constant 0 : i32
    %9 = arith.cmpi eq, %arg1, %c0_i32_7 : i32
    %10 = arith.extui %9 : i1 to i32
    %c0_i32_8 = arith.constant 0 : i32
    %11 = arith.cmpi ne, %10, %c0_i32_8 : i32
    scf.if %11 {
      %c0_9 = arith.constant 0 : index
      %c0_10 = arith.constant 0 : index
      %12 = vector.load %arg4[%c0_9, %c0_10] : memref<4x4xf32, #tpu.memory_space<vmem>>, vector<4x4xf32>
      %cst_11 = arith.constant dense<0x7F800000> : vector<4xf32>
      %13 = vector.multi_reduction <minimumf>, %12, %cst_11 [1] : vector<4x4xf32> to vector<4xf32>
      %14 = vector.shape_cast %13 : vector<4xf32> to vector<4x1xf32>
      %15 = vector.broadcast %14 : vector<4x1xf32> to vector<4x4xf32>
      %16 = arith.subf %15, %12 : vector<4x4xf32>
      %17 = math.exp %16 : vector<4x4xf32>
      %cst_12 = arith.constant dense<0.000000e+00> : vector<4xf32>
      %18 = vector.multi_reduction <add>, %17, %cst_12 [1] : vector<4x4xf32> to vector<4xf32>
      %19 = vector.shape_cast %18 : vector<4xf32> to vector<4x1xf32>
      %20 = tpu.reciprocal %19 : vector<4x1xf32> -> vector<4x1xf32>
      %21 = vector.broadcast %20 : vector<4x1xf32> to vector<4x4xf32>
      %22 = arith.mulf %17, %21 : vector<4x4xf32>
      %c0_13 = arith.constant 0 : index
      %c0_14 = arith.constant 0 : index
      %c0_15 = arith.constant 0 : index
      %23 = vector.load %arg3[%c0_13, %c0_14, %c0_15] : memref<1x4x4xf32, #tpu.memory_space<vmem>>, vector<1x4x4xf32>
      %24 = vector.shape_cast %23 : vector<1x4x4xf32> to vector<4x4xf32>
      %25 = vector.shape_cast %22 : vector<4x4xf32> to vector<1x4x4xf32>
      tpu.vector_store %arg3[%c0_13, %c0_14, %c0_15], %25 {strides = array<i32>} : memref<1x4x4xf32, #tpu.memory_space<vmem>>, vector<1x4x4xf32>,
    } else {
    }
    return
  }
  func.func @transform_0(%arg0: i32, %arg1: i32) -> (i32, i32, i32) {
    %c0_i32 = arith.constant 0 : i32
    %c0_i32_0 = arith.constant 0 : i32
    return %arg0, %c0_i32, %arg1 : i32, i32, i32
  }
  func.func @transform_1(%arg0: i32, %arg1: i32) -> (i32, i32, i32) {
    %c0_i32 = arith.constant 0 : i32
    %c0_i32_0 = arith.constant 0 : i32
    %c0_i32_1 = arith.constant 0 : i32
    return %arg0, %c0_i32, %c0_i32_0 : i32, i32, i32
  }
}

</mosaic_0001>

<bundles_post_ra>
// kernel: tpu_custom_call.1
= control target key start
LH: loop header
LB: loop body
LE: loop exit
PB: predicated region body
PF: predicated region fallthrough
CT: control target
= control target key end

     0   :  { %6 = vsyncpa [#allocation4], 0  ;;  %s733_s0 = inlined_call_operand.hbm [shape: f32[2,4,256], index: 0, kind: input, shape index: {}]   ;;  %s734_s1 = inlined_call_operand.hbm [shape: f32[2,4,4], index: 1, kind: output, shape index: {}]  }
   0x1   :  { %8 = vsyncpa [#allocation4 + $0x1], 0 }
   0x2   :  { %9 = vsyncpa [#allocation5], 0 }
   0x3   :  { %11 = vsyncpa [#allocation5 + $0x1], 0  ;;  %s555_s6 = smov 0   ;;  %s557_s7 = smov 0  }
   0x4   :  { %s559_s8 = smov 0   ;;  %s561_s9 = smov 0  }
   0x5   :  { %s563_s10 = smov 0   ;;  %s565_s11 = smov 0  }
   0x6 LB: > { %s345_s12 = sadd.s32 4294967295, %s540_s11   ;;  %s346_s13 = sadd.s32 4294967294, %s540_s11   ;;  %s540_s11 = sphi %s565_s11, %s17_s11   ;;  %s536_s10 = sphi %s563_s10, %s750_s10   ;;  %s532_s9 = sphi %s561_s9, %s749_s9   ;;  %s528_s8 = sphi %s559_s8, %s748_s8   ;;  %s524_s7 = sphi %s557_s7, %s747_s7   ;;  %s520_s6 = sphi %s555_s6, %s746_s6  }
   0x7   : > { %s29_s14 = sadd.s32 1, %s536_s10  ;;  %s38_s15 = sadd.s32 1, %s528_s8 }
   0x8   : > { %p31_p0 = scmp.ge.s32.totalorder %s29_s14, 2  ;;  %p45_p1 = scmp.ne.s32.totalorder %s528_s8, %s524_s7 }
   0x9   : > { %p46_p2 = scmp.eq.s32.totalorder %s540_s11, 0  ;;  %p51_p3 = scmp.ne.s32.totalorder %s524_s7, %s520_s6 }
   0xa   : > { %s752_s14 = smov (%p31_p0, %s29_s14), 0  ;;  %p52_p5 = scmp.eq.s32.totalorder %s345_s12, 0 }
   0xb   : > { %p596_p4 = por %p46_p2, %p45_p1  ;;  %s33_s17 = ssub.s32 %s536_s10, %s752_s14 }
   0xc   : > { %p75_p6 = scmp.eq.s32.totalorder %s345_s12, 1  ;;  %p36_p7 = scmp.eq.s32.totalorder %s33_s17, 0 }
   0xd   : > { %p602_p8 = por %p52_p5, %p51_p3  ;;  %p81_p10 = scmp.eq.s32.totalorder %s346_s13, 1 }
   0xe   : > { %p606_p9 = por %p75_p6, %p45_p1  ;;  %p372_p13 = scmp.lt.s32.totalorder %s540_s11, 2 }
   0xf   : > { %s611_s20 = scalar_select %p36_p7, %s528_s8, %s38_s15  }
  0x10   : > { %s738_s19 = scalar_select %p606_p9, 1, 0 }
  0x11   : > { %p613_p11 = por %p81_p10, %p51_p3  ;;  %s101_s22 = sand.u32 1, %s528_s8  }
  0x12   : > { %s349_s23 = sshll.u32 %s101_s22, 3  ;;  %s359_s24 = sshll.u32 %s536_s10, 7 }
  0x13   : > { %s739_s21 = scalar_select %p613_p11, 1, 0 }
  0x14   : > { %s624_s27 = scalar_lea.hbm %s733_s0, %s359_s24  ;;  %s105_s28 = scalar_lea.vmem [#allocation3], %s349_s23 }
  0x15   : > { %s115_s29 = sshll.u32 %s105_s28, 4  ;;  %p630_p0 = pnand %p372_p13, %p596_p4  ;;  %s626_s29 = int_to_ptr.vmem [resolvable:$true] %s115_s29 }
  0x16   : > { %s102_s2 = scalar_lea.sflag [#allocation4], %s101_s22  ;;  %s428_s3 = scalar_lea.hbm %s624_s27, 128 }
  0x17   : > { %p429_p3 = scmp.ne.s32.totalorder %s624_s27, %s428_s3  ;;  %p430_p5 = pneg %p630_p0 }
  0x18   : > { %s433_s12 = scalar_lea.hbm %s733_s0, 256  ;;  %p434_p4 = scmp.lt.u32.totalorder %s624_s27, %s733_s0 }
  0x19   : > { %p431_p6 = pnand %p430_p5, %p429_p3  ;;  %p435_p10 = scmp.lt.u32.totalorder %s433_s12, %s428_s3 }
  0x1a   : > { %p437_p12 = scmp.lt.u32.totalorder %s428_s3, %s624_s27 }
  0x1b   : > { %p432_p7 = pneg %p431_p6  ;;  %p436_p13 = por %p435_p10, %p434_p4 }
  0x1d   : > { %p438_p1 = por %p437_p12, %p436_p13 }
  0x1f   : > { %p439_p2 = pnand %p438_p1, %p432_p7 }
  0x21   : > { %442 = shalt.err (!%p439_p2)
}
  0x22   : > { %s443_s16 = scalar_lea.vmem %s626_s29, 128  ;;  %s542_s17 = smov [#allocation3]  }
  0x23   : > { %p444_p3 = scmp.ne.s32.totalorder %s626_s29, %s443_s16  ;;  %s448_s22 = sshll.u32 %s542_s17, 4  ;;  %s449_s22 = int_to_ptr.vmem [resolvable:$false] %s448_s22 }
  0x24   : > { %s450_s23 = scalar_lea.vmem %s449_s22, 256  ;;  %p451_p9 = scmp.lt.s32.totalorder %s626_s29, %s449_s22 }
  0x25   : > { %p446_p6 = pnand %p444_p3, %p430_p5  ;;  %p452_p4 = scmp.lt.s32.totalorder %s450_s23, %s443_s16 }
  0x27   : > { %p447_p11 = pneg %p446_p6  ;;  %p453_p10 = por %p452_p4, %p451_p9 }
  0x29   : > { %p454_p12 = pnand %p453_p10, %p447_p11 }
  0x2b   : > { %457 = shalt.err (!%p454_p12)
}
  0x2c   : > { %367 = dma.hbm_to_vmem [thread:$0]  (!%p630_p0), %s624_s27, 128, %s626_s29, %s102_s2  }
  0x2d   : > { %p741_p1 = scmp.lt.s32.totalorder %s540_s11, 3  ;;  %p742_p2 = scmp.ge.s32.totalorder %s540_s11, 1 }
  0x2f   : > { %p121_p5 = pnand %p742_p2, %p741_p1 }
  0x30   : > { %s666_s24 = sand.u32 (!%p121_p5), 1, %s524_s7  }
  0x31   : > { %124 = sbr.rel (%p121_p5) target bundleno = 614 (0x266), region = 24  ;;  %s353_s25 = sshll.u32 (!%p121_p5), %s666_s24, 3 }
  0x32   : > { %s127_s26 = scalar_lea.sflag (!%p121_p5), [#allocation4], %s666_s24  ;;  %s130_s28 = scalar_lea.vmem (!%p121_p5), [#allocation3], %s353_s25 }
  0x38   : > { %511 = dma.done.wait (%p602_p8), %s127_s26, 128  }
  0x39   : > { %513 = vsyncadd (%p602_p8), %s127_s26, 4294967168  ;;  %vm154_vm0 = vcmask 27648   ;;  %v543_v0 = vmov 0.0   ;;  %v156_v1 = vld [vmem:[%s130_s28] sm:$0xff]  ;;  %s354_s18 = sshll.u32 %s666_s24, 2  ;;  %s356_s27 = sshll.u32 %s532_s9, 6 }
  0x3a   : > { %155 = vst.msk [vmem:[#allocation2] sm:$0xf] %vm154_vm0, %v543_v0  ;;  %v159_v2 = vcombine.high %v156_v1, %v156_v1  ;;  %s148_s29 = scalar_lea.vmem [#allocation6], %s354_s18  ;;  %s683_s4 = scalar_lea.hbm %s734_s1, %s356_s27 }
  0x3b   : > { %s264_s30 = sshll.u32 %s148_s29, 4  ;;  %s251_s5 = scalar_lea.sflag [#allocation5], %s666_s24  ;;  %s685_s30 = int_to_ptr.vmem [resolvable:$true] %s264_s30 }
  0x3c   : > { %161 = vmatprep.subr.mxu0 %v159_v2  ;;  %225 = vmatprep.mubr.f32.mxu0 %v159_v2  ;;  %s458_s12 = scalar_lea.vmem %s685_s30, 64  ;;  %p743_p9 = scmp.ne.s32.totalorder %s738_s19, 0 }
  0x3d   : > { %162 = vmatpush1.xpose.msra.mxu0 %v156_v1  ;;  %p459_p8 = scmp.ne.s32.totalorder %s685_s30, %s458_s12  ;;  %s544_s9 = smov [#allocation6]  }
  0x3e   : > { %s462_s13 = sshll.u32 %s544_s9, 4  ;;  %s463_s13 = int_to_ptr.vmem [resolvable:$false] %s462_s13 }
  0x3f   : > { %p460_p11 = pnand %p459_p8, %p743_p9  ;;  %s464_s15 = scalar_lea.vmem %s463_s13, 128 }
  0x40   : > { %226 = vmatmul.mubr.f32.vlgmr.msra.gmra.mrb[0].mxu0 %v156_v1  ;;  %p465_p7 = scmp.lt.s32.totalorder %s685_s30, %s463_s13  ;;  %p466_p13 = scmp.lt.s32.totalorder %s464_s15, %s458_s12 }
  0x41   : > { %v157_v3 = vld [vmem:[#allocation2] sm:$0xf]  ;;  %p461_p0 = pneg %p460_p11 }
  0x42   : > { %p467_p3 = por %p466_p13, %p465_p7 }
  0x44   : > { %p468_p6 = pnand %p467_p3, %p461_p0 }
 0x113   : > { %v227_v4 = vpop.f32.mrb[0].mxu0 }
 0x114   : > { %v231_v5 = vadd.f32 %v227_v4, %v157_v3  ;;  %v229_v6 = vpop.f32.mrb[1].mxu0 }
 0x116   : > { %233 = vst.msk [vmem:[#allocation2] sm:$0xf] %vm154_vm0, %v231_v5 }
 0x11d   : > { %v237_v7 = vld [vmem:[#allocation2] sm:$0xf] }
 0x11e   : > { %v238_v8 = vsel %vm154_vm0, %v237_v7, inf }
 0x11f   : > { %239 = vmin.xlane.f32.xlu0 %v238_v8 }
 0x1ac   : > { %v240_v9 = vpop.xlane.xlu0 %239 }
 0x1ad   : > { %v241_v10 = vsub.f32 %v240_v9, %v237_v7 }
 0x1af   : > { %v242_v11 = vmul.f32 1.442695, %v241_v10 }
 0x1b1   : > { %424 = vpow2.f32 %v242_v11 }
 0x1bb   : > { %v425_v12 = vpop.eup %424 }
 0x1bc   : > { %v244_v13 = vsel %vm154_vm0, %v425_v12, 0.0 }
 0x1bd   : > { %245 = vadd.xlane.f32.xlu0 %v244_v13 }
 0x24a   : > { %v246_v14 = vpop.xlane.xlu0 %245 }
 0x24b   : > { %426 = vrcp.f32 %v246_v14 }
 0x255   : > { %v427_v15 = vpop.eup %426 }
 0x256   : > { %v248_v16 = vmul.f32 %v427_v15, %v425_v12 }
 0x258   : > { %249 = vst.msk [vmem:[%s148_s29] sm:$0xf] %vm154_vm0, %v248_v16 }
 0x259   : > { %471 = shalt.err (!%p468_p6)
}
 0x25a   : > { %s472_s16 = scalar_lea.hbm %s683_s4, 64  ;;  %s476_s23 = scalar_lea.hbm %s734_s1, 128 }
 0x25b   : > { %p473_p4 = scmp.ne.s32.totalorder %s683_s4, %s472_s16  ;;  %p477_p1 = scmp.lt.u32.totalorder %s683_s4, %s734_s1 }
 0x25c   : > { %p478_p2 = scmp.lt.u32.totalorder %s476_s23, %s472_s16  ;;  %p480_p8 = scmp.lt.u32.totalorder %s472_s16, %s683_s4 }
 0x25d   : > { %p474_p10 = pnand %p473_p4, %p743_p9 }
 0x25e   : > { %p479_p5 = por %p478_p2, %p477_p1 }
 0x25f   : > { %p475_p12 = pneg %p474_p10 }
 0x260   : > { %p481_p11 = por %p480_p8, %p479_p5 }
 0x262   : > { %p482_p0 = pnand %p481_p11, %p475_p12 }
 0x264   : > { %485 = shalt.err (!%p482_p0)
}
 0x265   : > { %362 = dma.vmem_to_hbm [thread:$0]  (%p743_p9), %s685_s30, 64, %s683_s4, %s251_s5  }
 0x266 PF: > { %s276_s26 = sand.u32 1, %s520_s6   ;;  %p744_p7 = scmp.ne.s32.totalorder %s739_s21, 0 }
 0x267   : > { %p745_p13 = scmp.ge.s32.totalorder %s540_s11, 2  ;;  %s277_s28 = scalar_lea.sflag [#allocation5], %s276_s26 }
 0x269   : > { %p369_p3 = pnand %p745_p13, %p744_p7 }
 0x26b   : > { %515 = dma.done.wait (!%p369_p3), %s277_s28, 64  }
 0x26c   : > { %517 = vsyncadd (!%p369_p3), %s277_s28, 4294967232  ;;  %s17_s11 = sadd.s32 1, %s540_s11   ;;  %s746_s6 = smov %s524_s7 }
 0x26d   : > { %p14_p6 = scmp.ge.s32.totalorder %s17_s11, 4   ;;  %s747_s7 = smov %s528_s8 }
 0x26e   : > { %s748_s8 = smov %s611_s20  ;;  %s749_s9 = smov %s536_s10 }
 0x26f   : > { %s750_s10 = smov %s752_s14  ;;  %16 = sbr.rel (!%p14_p6) target bundleno = 6 (0x6), region = 77 }
 0x276   :  { %282 = vsyncpa [#allocation4], 1 }
 0x277   :  { %284 = vsyncpa [#allocation4 + $0x1], 1 }
 0x278   :  { %285 = vsyncpa [#allocation5], 1 }
 0x279   :  { %287 = vsyncpa [#allocation5 + $0x1], 1 }

</bundles_post_ra>
